<compile_context>
chip_gen: v5e
topology: v5e:2x2
jax: 0.10.0
libtpu: 0.0.40
codegen_flags: <defaults>
</compile_context>

<pallas_src>
import numpy as np
import jax
import jax.numpy as jnp
from jax import lax
from jax.experimental import pallas as pl
from jax.experimental.pallas import tpu as pltpu


def _round_up(x, m):
    return (x + m - 1) // m * m


# --------------------------------------------------------------------------
# Activation helper (static `act` string).  exact=True -> pure-JAX reference path.
# --------------------------------------------------------------------------
def _apply_act(y, act, exact=False):
    if act == 'silu':
        if exact:
            return y * (1.0 / (1.0 + jnp.exp(-y)))
        # exp -> EUP, approx reciprocal -> EUP: frees VALU slots in the epilogue.
        return y * pl.reciprocal(1.0 + jnp.exp(-y), approx=True)
    if act == 'relu':
        return jnp.maximum(y, 0.0)
    if act == 'lrelu':
        return jnp.where(y >= 0.0, y, 0.1 * y)
    if act in (None, 'none'):
        return y
    raise ValueError(f'Unsupported act type: {act}')


# --------------------------------------------------------------------------
# Wrapper-side (one-time) constant builders
# --------------------------------------------------------------------------
def _conv_wk_stacked(w_hwio, W_sp, pad):
    """(K,K,Cin,Cout) weight -> (K*W*Cin, W*Cout) stacked lane-mixing matrix.
    Folds kw shift, W zero-padding and channel mixing; stacked kh-major so the whole
    KxK conv is ONE matmul against the lane-concatenated row-shifted activations."""
    w = np.asarray(w_hwio, np.float32)
    K, _, Cin, Cout = w.shape
    kw = np.arange(K)[:, None, None]
    w_in = np.arange(W_sp)[None, :, None]
    w_out = np.arange(W_sp)[None, None, :]
    sel = (w_in == (w_out + kw - pad)).astype(np.float32)          # (K, Win, Wout)
    wk = np.einsum('kuv,hkio->huivo', sel, w)                       # (kh, Win, Cin, Wout, Cout)
    return wk.reshape(K * W_sp * Cin, W_sp * Cout)


def _dw_to_full(w_hwc):
    """(K,K,C) depthwise weight -> (K,K,C,C) full weight with diagonal channel mixing."""
    w = np.asarray(w_hwc, np.float32)
    C = w.shape[-1]
    return w[:, :, :, None] * np.eye(C, dtype=np.float32)[None, None]


def _pool_csel(W_sp, C):
    """0/1 lane-compaction matrix for 2x2 pooling: (W*C, out_w) with out_w padded to a
    multiple of 128 so the output store is full-lane-width (unmasked)."""
    Wo = W_sp // 2
    out_w = max(128, _round_up(Wo * C, 128))
    m = np.zeros((W_sp * C, out_w), np.float32)
    for wo in range(Wo):
        for c in range(C):
            m[2 * wo * C + c, wo * C + c] = 1.0
    return m, out_w


def bn_fold(bn, bias=None):
    scale = np.asarray(bn['gamma'], np.float32) / np.sqrt(
        np.asarray(bn['var'], np.float32) + bn['eps'])
    shift = np.asarray(bn['beta'], np.float32) - np.asarray(bn['mean'], np.float32) * scale
    if bias is not None:
        shift = shift + scale * np.asarray(bias, np.float32)
    return scale, shift


def _tile_row(v, W_sp):
    """Per-channel (C,) vector -> lane-dense (1, W*C) row (channel fastest)."""
    return np.tile(np.asarray(v, np.float32).reshape(1, -1), (1, W_sp))


def _pack_slab(mats, dtype, row_align):
    """Stack constant matrices into one contiguous slab (one HBM->VMEM DMA).
    Returns (slab, [(row_off, n_rows, n_cols), ...]); row offsets are row_align-aligned
    so every in-kernel static slice starts on a (sub)lane-tile boundary."""
    if not mats:
        mats = [np.zeros((row_align, 128), np.float32)]
    width = _round_up(max(int(m.shape[1]) for m in mats), 128)
    offs, blocks, r = [], [], 0
    for m in mats:
        m = np.asarray(m, np.float32)
        nr, nc = m.shape
        nr_pad = _round_up(nr, row_align)
        blk = np.zeros((nr_pad, width), np.float32)
        blk[:nr, :nc] = m
        offs.append((r, nr, nc))
        blocks.append(blk)
        r += nr_pad
    return jnp.asarray(np.concatenate(blocks, axis=0), dtype), offs


# --------------------------------------------------------------------------
# In-kernel helper: row shift with per-image zero fill (batch-aware).
# --------------------------------------------------------------------------
def _shift_rows(x, s, H, ho_idx):
    """shifted[r] = x[r + s] if the source row is inside the same image, else 0."""
    if s == 0:
        return x
    nrows = x.shape[0]
    sh = pltpu.roll(x, shift=(-s) % nrows, axis=0)           # sublane rotate (XLU)
    valid = (ho_idx + s >= 0) & (ho_idx + s < H)
    return jnp.where(valid, sh, 0.0)


# --------------------------------------------------------------------------
# Fused-graph builder: walks the node config once, packs all constants into two
# slabs, and returns a forward() backed by ONE pallas_call (grid over batch).
# --------------------------------------------------------------------------
def build_fused_forward(nodes, params, x_shape, use_bf16=True):
    N, C0, H0, W0 = x_shape
    op_dtype = jnp.bfloat16 if use_bf16 else jnp.float32

    w_mats, a_mats = [], []          # constant matrices to pack (weights / affine rows)
    w_offs, a_offs = [], []          # filled after packing; closures read them lazily

    def add_w(m):
        w_mats.append(np.asarray(m, np.float32))
        return len(w_mats) - 1

    def add_a(m):
        a_mats.append(np.asarray(m, np.float32))
        return len(a_mats) - 1

    dims = {'input': dict(layout='dense', H=H0, W=W0, C=C0)}
    plan = []                        # [(name, fn(data, wref, aref) -> value)]

    def make_conv(inp, K, pad, w_full, Hc, Wc, bias_c, scale_c, shift_c, act):
        wi = add_w(_conv_wk_stacked(w_full, Wc, pad))
        si = add_a(_tile_row(scale_c, Wc)) if scale_c is not None else None
        bi = add_a(_tile_row(shift_c, Wc)) if shift_c is not None else None
        ci = add_a(_tile_row(bias_c, Wc)) if bias_c is not None else None

        def fn(data, wref, aref):
            x = data[inp]
            if K == 1 and pad == 0:
                ops = x
            else:
                ho = lax.broadcasted_iota(jnp.int32, x.shape, 0) % Hc
                ops = jnp.concatenate(
                    [_shift_rows(x, kh - pad, Hc, ho) for kh in range(K)], axis=1)
            r0, nr, nc = w_offs[wi]
            y = jnp.dot(ops.astype(op_dtype), wref[r0:r0 + nr, :nc],
                        preferred_element_type=jnp.float32)
            if ci is not None:
                cr0, _, cnc = a_offs[ci]
                y = y + aref[cr0:cr0 + 1, :cnc]
            if si is not None:
                sr0, _, snc = a_offs[si]
                br0, _, bnc = a_offs[bi]
                y = y * aref[sr0:sr0 + 1, :snc] + aref[br0:br0 + 1, :bnc]
            return _apply_act(y, act)
        return fn

    for node in nodes:
        name, t, inp = node['name'], node['type'], node['input']
        p = params.get(name, {})
        if t == 'conv-bn-act':
            d = dims[inp]
            Hc, Wc = d['H'], d['W']
            K, pad, act = node['kernel_size'], node['padding'], node['activation']
            assert node['stride'] == 1, 'fused kernel supports stride=1 convs only'  # TODO(synk)
            cout = node['out_channels']
            depthwise = node['groups'] in (None, -1) and K != 1
            if depthwise:
                s1, b1 = bn_fold(p['bn_dw'])
                tmp = name + '.__dw'
                plan.append((tmp, make_conv(inp, K, pad, _dw_to_full(p['w_dw']),
                                            Hc, Wc, None, s1, b1, act)))
                dims[tmp] = dict(layout='dense', H=Hc, W=Wc, C=cout)
                s2, b2 = bn_fold(p['bn_pw'], p.get('bias'))
                plan.append((name, make_conv(tmp, 1, 0, p['w_pw'], Hc, Wc,
                                             None, s2, b2, act)))
            else:
                s, b = bn_fold(p['bn'], p.get('bias'))
                plan.append((name, make_conv(inp, K, pad, p['w'], Hc, Wc,
                                             None, s, b, act)))
            dims[name] = dict(layout='dense', H=Hc, W=Wc, C=cout)

        elif t == 'conv':
            d = dims[inp]
            Hc, Wc = d['H'], d['W']
            K, pad = node['kernel_size'], node['padding']
            assert node['stride'] == 1, 'fused kernel supports stride=1 convs only'  # TODO(synk)
            cout = node['out_channels']
            depthwise = node['groups'] in (None, -1) and K != 1
            w_full = _dw_to_full(p['w']) if depthwise else p['w']
            plan.append((name, make_conv(inp, K, pad, w_full, Hc, Wc,
                                         p.get('bias'), None, None, None)))
            dims[name] = dict(layout='dense', H=Hc, W=Wc, C=cout)

        elif t == 'bn':
            d = dims[inp]
            s, b = bn_fold(p)
            si, bi = add_a(_tile_row(s, d['W'])), add_a(_tile_row(b, d['W']))

            def fn(data, wref, aref, _inp=inp, _si=si, _bi=bi):
                sr0, _, snc = a_offs[_si]
                br0, _, bnc = a_offs[_bi]
                return data[_inp] * aref[sr0:sr0 + 1, :snc] + aref[br0:br0 + 1, :bnc]
            plan.append((name, fn))
            dims[name] = dict(d)

        elif t == 'act':
            def fn(data, wref, aref, _inp=inp, _act=node['function']):
                return _apply_act(data[_inp], _act)
            plan.append((name, fn))
            dims[name] = dict(dims[inp])

        elif t == 'sum':
            srcs = tuple(inp) if isinstance(inp, (list, tuple)) else (inp,)

            def fn(data, wref, aref, _srcs=srcs):
                acc = data[_srcs[0]]
                for s_ in _srcs[1:]:
                    acc = acc + data[s_]
                return acc
            plan.append((name, fn))
            dims[name] = dict(dims[srcs[0]])

        elif t == 'pool2x2':
            d = dims[inp]
            if d['layout'] != 'dense':
                raise NotImplementedError('chained pool2x2 not supported')  # TODO(synk)
            Hc, Wc, C = d['H'], d['W'], d['C']
            assert Hc % 2 == 0 and Wc % 2 == 0  # TODO(synk): odd H/W would drop last row/col
            csel, out_w = _pool_csel(Wc, C)
            wi = add_w(csel)

            def fn(data, wref, aref, _inp=inp, _wi=wi, _H=Hc, _C=C, _WC=Wc * C):
                v = data[_inp]
                nrows = v.shape[0]
                ho = lax.broadcasted_iota(jnp.int32, v.shape, 0) % _H
                # vertical 2-max: row shift by +1, zero past each image's last row
                dn = pltpu.roll(v, shift=(nrows - 1) % nrows, axis=0)   # dn[r] = v[r+1]
                dn = jnp.where(ho + 1 < _H, dn, 0.0)                    # batch-image aware
                vm = jnp.maximum(v, dn)
                # horizontal 2-max: lane shift by +C (wrapped lanes land on discarded cols)
                rt = pltpu.roll(vm, shift=(_WC - _C) % _WC, axis=1)     # rt[:, l] = vm[:, l+C]
                hm = jnp.maximum(vm, rt)
                # single 0/1 lane-compaction matmul (also pads to 128-lane output slab)
                r0, nr, nc = w_offs[_wi]
                return jnp.dot(hm.astype(op_dtype), wref[r0:r0 + nr, :nc],
                               preferred_element_type=jnp.float32)
            plan.append((name, fn))
            dims[name] = dict(layout='pool', Hin=Hc, Ho=Hc // 2, Wo=Wc // 2, C=C, pad_w=out_w)

        else:
            raise ValueError(f'Unsupported node type: {t}')

    # ---- pack constants into two contiguous slabs (2 DMAs total) ----------
    wslab, w_off_list = _pack_slab(w_mats, op_dtype, 16 if use_bf16 else 8)
    aslab, a_off_list = _pack_slab(a_mats, jnp.float32, 8)
    w_offs.extend(w_off_list)
    a_offs.extend(a_off_list)

    out_names = [n['name'] for n in nodes if n['is_output']]
    out_metas = [dims[nm] for nm in out_names]

    def _oshape(m):
        if m['layout'] == 'dense':
            return (N * m['H'], m['W'] * m['C'])
        return (N * m['Hin'], m['pad_w'])

    out_shapes = [_oshape(m) for m in out_metas]

    # ---- the single fused kernel (one grid step per batch image) ----------
    def kernel(x_ref, wref, aref, *orefs):
        data = {'input': x_ref[...]}
        for nname, fn in plan:
            data[nname] = fn(data, wref, aref)
        for oref, nname in zip(orefs, out_names):
            oref[...] = data[nname].astype(oref.dtype)

    in_specs = [
        pl.BlockSpec((H0, W0 * C0), lambda i: (i, 0)),
        pl.BlockSpec(wslab.shape, lambda i: (0, 0)),     # grid-invariant: fetched once
        pl.BlockSpec(aslab.shape, lambda i: (0, 0)),     # grid-invariant: fetched once
    ]
    out_specs = [pl.BlockSpec((s[0] // N, s[1]), lambda i: (i, 0)) for s in out_shapes]

    fused_call = pl.pallas_call(
        kernel,
        out_shape=[jax.ShapeDtypeStruct(s, jnp.float32) for s in out_shapes],
        grid=(N,),
        in_specs=in_specs,
        out_specs=out_specs,
        compiler_params=pltpu.CompilerParams(
            dimension_semantics=("parallel",),           # images are independent (v7x dual-TC)
            vmem_limit_bytes=8 * 1024 * 1024,            # actual footprint << 1 MiB
        ),
    )

    def forward(x_nchw):
        # NCHW -> lane-dense (N*H, W*C)
        x2d = jnp.transpose(x_nchw, (0, 2, 3, 1)).astype(jnp.float32).reshape(
            N * H0, W0 * C0)
        outs = fused_call(x2d, wslab, aslab)
        if not isinstance(outs, (list, tuple)):
            outs = [outs]
        res = []
        for o2d, m in zip(outs, out_metas):
            if m['layout'] == 'dense':
                o = o2d.reshape(N, m['H'], m['W'], m['C'])
            else:
                # wrapper-side layout plumbing: strided even-row pick + lane unpad
                o = o2d.reshape(N, m['Hin'], -1)[:, ::2, : m['Wo'] * m['C']]
                o = o.reshape(N, m['Ho'], m['Wo'], m['C'])
            res.append(jnp.transpose(o, (0, 3, 1, 2)))   # back to NCHW
        return res

    return forward


# --------------------------------------------------------------------------
# VanillaCNN node configuration (one representative, valid config)
# --------------------------------------------------------------------------
NODES = [
    dict(type='conv-bn-act', name='stem', input='input', is_output=False,
         in_channels=4, out_channels=8, kernel_size=3, stride=1, padding=1,
         bias=False, activation='silu', groups=1),
    dict(type='conv-bn-act', name='dw', input='previous', is_output=False,
         in_channels=8, out_channels=8, kernel_size=3, stride=1, padding=1,
         bias=False, activation='relu', groups=-1),          # depthwise + pointwise path
    dict(type='conv', name='proj', input='previous', is_output=False,
         in_channels=8, out_channels=8, kernel_size=1, stride=1, padding=0,
         bias=True, activation=None, groups=1),
    dict(type='bn', name='bn1', input='previous', is_output=False,
         num_features=8, eps=1e-5, momentum=0.1),
    dict(type='act', name='act1', input='previous', is_output=False, function='lrelu'),
    dict(type='sum', name='sum1', input=['stem', 'act1'], is_output=False),
    dict(type='pool2x2', name='pool1', input='previous', is_output=True),
]


def resolve_inputs(nodes):
    nodes = [dict(n) for n in nodes]
    prev = 'input'
    for n in nodes:
        if n['input'] == 'previous':
            n['input'] = prev
        prev = n['name']
    return nodes


# --------------------------------------------------------------------------
# Deterministic parameter init
# --------------------------------------------------------------------------
def _bn_init(key, c, eps=1e-5):
    k1, k2, k3, k4 = jax.random.split(key, 4)
    return dict(
        gamma=jax.random.uniform(k1, (c,), jnp.float32, 0.5, 1.5),
        beta=jax.random.normal(k2, (c,), jnp.float32) * 0.1,
        mean=jax.random.normal(k3, (c,), jnp.float32) * 0.1,
        var=jax.random.uniform(k4, (c,), jnp.float32, 0.5, 1.5),
        eps=eps,
    )


def init_params(key, nodes):
    params = {}
    for node in nodes:
        key, sub = jax.random.split(key)
        t = node['type']
        name = node['name']
        if t == 'conv-bn-act':
            cin, cout, k = node['in_channels'], node['out_channels'], node['kernel_size']
            if node['groups'] in (None, -1) and k != 1:
                assert cout == cin, 'depthwise path assumes out_channels == in_channels'
                k1, k2, k3, k4 = jax.random.split(sub, 4)
                params[name] = dict(
                    w_dw=jax.random.normal(k1, (k, k, cout), jnp.float32) * 0.1,
                    bn_dw=_bn_init(k2, cout),
                    w_pw=jax.random.normal(k3, (1, 1, cout, cout), jnp.float32) * 0.1,
                    bn_pw=_bn_init(k4, cout),
                )
            else:
                k1, k2, k3 = jax.random.split(sub, 3)
                p = dict(
                    w=jax.random.normal(k1, (k, k, cin, cout), jnp.float32) * 0.1,
                    bn=_bn_init(k2, cout),
                )
                if node['bias']:
                    p['bias'] = jax.random.normal(k3, (cout,), jnp.float32) * 0.1
                params[name] = p
        elif t == 'conv':
            cin, cout, k = node['in_channels'], node['out_channels'], node['kernel_size']
            k1, k2 = jax.random.split(sub)
            if node['groups'] in (None, -1) and k != 1:
                p = dict(w=jax.random.normal(k1, (k, k, cout), jnp.float32) * 0.1)
            else:
                p = dict(w=jax.random.normal(k1, (k, k, cin, cout), jnp.float32) * 0.1)
            if node['bias']:
                p['bias'] = jax.random.normal(k2, (cout,), jnp.float32) * 0.1
            params[name] = p
        elif t == 'bn':
            params[name] = _bn_init(sub, node['num_features'], node['eps'])
        else:
            params[name] = {}
    return params


# --------------------------------------------------------------------------
# Pure-JAX reference (for correctness checking)
# --------------------------------------------------------------------------
def _ref_conv(x, w_hwio, pad, groups=1):
    return lax.conv_general_dilated(
        x, w_hwio, window_strides=(1, 1), padding=[(pad, pad), (pad, pad)],
        dimension_numbers=('NHWC', 'HWIO', 'NHWC'), feature_group_count=groups)


def _ref_bn(x, bn):
    return bn['gamma'] * (x - bn['mean']) / jnp.sqrt(bn['var'] + bn['eps']) + bn['beta']


def ref_forward(x_nchw, nodes, params):
    x = jnp.transpose(x_nchw, (0, 2, 3, 1)).astype(jnp.float32)
    data = {'input': x}
    output_names = [n['name'] for n in nodes if n['is_output']]
    for node in nodes:
        name, t, inp = node['name'], node['type'], node['input']
        p = params[name]
        if t == 'conv-bn-act':
            xin = data[inp]
            k, pad, act = node['kernel_size'], node['padding'], node['activation']
            if node['groups'] in (None, -1) and k != 1:
                C = node['out_channels']
                y = _ref_conv(xin, p['w_dw'].reshape(k, k, 1, C), pad, groups=C)
                y = _apply_act(_ref_bn(y, p['bn_dw']), act, exact=True)
                y = _ref_conv(y, p['w_pw'], 0)
                if 'bias' in p:
                    y = y + p['bias']
                y = _apply_act(_ref_bn(y, p['bn_pw']), act, exact=True)
            else:
                y = _ref_conv(xin, p['w'], pad)
                if 'bias' in p:
                    y = y + p['bias']
                y = _apply_act(_ref_bn(y, p['bn']), act, exact=True)
        elif t == 'conv':
            xin = data[inp]
            k, pad = node['kernel_size'], node['padding']
            if node['groups'] in (None, -1) and k != 1:
                C = node['out_channels']
                y = _ref_conv(xin, p['w'].reshape(k, k, 1, C), pad, groups=C)
            else:
                y = _ref_conv(xin, p['w'], pad)
            if 'bias' in p:
                y = y + p['bias']
        elif t == 'bn':
            y = _ref_bn(data[inp], p)
        elif t == 'act':
            y = _apply_act(data[inp], node['function'], exact=True)
        elif t == 'pool2x2':
            xin = data[inp]
            Nb, H, W, C = xin.shape
            y = xin.reshape(Nb, H // 2, 2, W // 2, 2, C).max(axis=(2, 4))
        elif t == 'sum':
            y = sum(data[n] for n in inp)
        data[name] = y
    return [jnp.transpose(data[n], (0, 3, 1, 2)) for n in output_names]


# --------------------------------------------------------------------------
if __name__ == "__main__":
    key = jax.random.PRNGKey(0)
    kx, kp = jax.random.split(key)
    x = jax.random.normal(kx, (2, 4, 16, 16), jnp.float32)   # NCHW, like PyTorch

    nodes = resolve_inputs(NODES)
    params = init_params(kp, nodes)

    fwd = jax.jit(build_fused_forward(nodes, params, x.shape, use_bf16=True))
    outs = fwd(x)
    outs = [jax.block_until_ready(o) for o in outs]

    refs = ref_forward(x, nodes, params)
    for o, r in zip(outs, refs):
        assert o.shape == r.shape, (o.shape, r.shape)
        # bf16 MXU operands with f32 accumulation/epilogue: tolerance relaxed from the
        # pure-f32 2e-4 of the previous version (set use_bf16=False to recover it).
        np.testing.assert_allclose(np.asarray(o), np.asarray(r), atol=2e-2, rtol=2e-2)

    print("KERNEL_OK")
</pallas_src>

<mosaic_0001>
module attributes {stable_mosaic.version = 11 : i64} {
  func.func @kernel(%arg0: i32, %arg1: memref<16x64xf32, #tpu.memory_space<vmem>>, %arg2: memref<960x128xbf16, #tpu.memory_space<vmem>>, %arg3: memref<72x128xf32, #tpu.memory_space<vmem>>, %arg4: memref<16x128xf32, #tpu.memory_space<vmem>>) attributes {dimension_semantics = [#tpu.dimension_semantics<parallel>], iteration_bounds = array<i64: 2>, scalar_prefetch = 0 : i64, scratch_operands = 0 : i64, tpu.core_type = #tpu.core_type<tc>, window_params = [{transform_indices = @transform_0, window_bounds = array<i64: 16, 64>}, {pipeline_mode = #tpu.pipeline_mode<synchronous>, transform_indices = @transform_1, window_bounds = array<i64: 960, 128>}, {pipeline_mode = #tpu.pipeline_mode<synchronous>, transform_indices = @transform_2, window_bounds = array<i64: 72, 128>}, {transform_indices = @transform_3, window_bounds = array<i64: 16, 128>}]} {
    %c0 = arith.constant 0 : index
    %c0_0 = arith.constant 0 : index
    %0 = vector.load %arg1[%c0, %c0_0] : memref<16x64xf32, #tpu.memory_space<vmem>>, vector<16x64xf32>
    %1 = tpu.iota {dimensions = array<i32: 0>} : vector<16x64xi32>
    %c16_i32 = arith.constant 16 : i32
    %c0_i32 = arith.constant 0 : i32
    %2 = arith.cmpi eq, %c16_i32, %c0_i32 : i32
    %c1_i32 = arith.constant 1 : i32
    %3 = arith.select %2, %c1_i32, %c16_i32 : i32
    %4 = vector.broadcast %3 : i32 to vector<16x64xi32>
    %5 = arith.remsi %1, %4 : vector<16x64xi32>
    %c0_i32_1 = arith.constant 0 : i32
    %6 = vector.broadcast %c0_i32_1 : i32 to vector<16x64xi32>
    %7 = arith.cmpi ne, %5, %6 : vector<16x64xi32>
    %c0_i32_2 = arith.constant 0 : i32
    %8 = vector.broadcast %c0_i32_2 : i32 to vector<16x64xi32>
    %9 = arith.cmpi slt, %5, %8 : vector<16x64xi32>
    %c0_i32_3 = arith.constant 0 : i32
    %10 = arith.cmpi slt, %3, %c0_i32_3 : i32
    %11 = vector.broadcast %10 : i1 to vector<16x64xi1>
    %12 = vector.broadcast %11 : vector<16x64xi1> to vector<16x64xi1>
    %13 = arith.xori %9, %12 : vector<16x64xi1>
    %14 = arith.andi %13, %7 : vector<16x64xi1>
    %15 = vector.broadcast %3 : i32 to vector<16x64xi32>
    %16 = arith.addi %5, %15 : vector<16x64xi32>
    %17 = arith.select %14, %16, %5 : vector<16x64xi1>, vector<16x64xi32>
    %c1_i32_4 = arith.constant 1 : i32
    %18 = tpu.dynamic_rotate %0 by %c1_i32_4 dim 0 : vector<16x64xf32>, i32 -> vector<16x64xf32>
    %c-1_i32 = arith.constant -1 : i32
    %19 = vector.broadcast %c-1_i32 : i32 to vector<16x64xi32>
    %20 = arith.addi %17, %19 : vector<16x64xi32>
    %c0_i32_5 = arith.constant 0 : i32
    %21 = vector.broadcast %c0_i32_5 : i32 to vector<16x64xi32>
    %22 = arith.cmpi sge, %20, %21 : vector<16x64xi32>
    %c-1_i32_6 = arith.constant -1 : i32
    %23 = vector.broadcast %c-1_i32_6 : i32 to vector<16x64xi32>
    %24 = arith.addi %17, %23 : vector<16x64xi32>
    %c16_i32_7 = arith.constant 16 : i32
    %25 = vector.broadcast %c16_i32_7 : i32 to vector<16x64xi32>
    %26 = arith.cmpi slt, %24, %25 : vector<16x64xi32>
    %27 = arith.andi %22, %26 : vector<16x64xi1>
    %cst = arith.constant 0.000000e+00 : f32
    %28 = vector.broadcast %cst : f32 to vector<16x64xf32>
    %29 = arith.select %27, %18, %28 : vector<16x64xi1>, vector<16x64xf32>
    %c15_i32 = arith.constant 15 : i32
    %30 = tpu.dynamic_rotate %0 by %c15_i32 dim 0 : vector<16x64xf32>, i32 -> vector<16x64xf32>
    %c1_i32_8 = arith.constant 1 : i32
    %31 = vector.broadcast %c1_i32_8 : i32 to vector<16x64xi32>
    %32 = arith.addi %17, %31 : vector<16x64xi32>
    %c0_i32_9 = arith.constant 0 : i32
    %33 = vector.broadcast %c0_i32_9 : i32 to vector<16x64xi32>
    %34 = arith.cmpi sge, %32, %33 : vector<16x64xi32>
    %c1_i32_10 = arith.constant 1 : i32
    %35 = vector.broadcast %c1_i32_10 : i32 to vector<16x64xi32>
    %36 = arith.addi %17, %35 : vector<16x64xi32>
    %c16_i32_11 = arith.constant 16 : i32
    %37 = vector.broadcast %c16_i32_11 : i32 to vector<16x64xi32>
    %38 = arith.cmpi slt, %36, %37 : vector<16x64xi32>
    %39 = arith.andi %34, %38 : vector<16x64xi1>
    %cst_12 = arith.constant 0.000000e+00 : f32
    %40 = vector.broadcast %cst_12 : f32 to vector<16x64xf32>
    %41 = arith.select %39, %30, %40 : vector<16x64xi1>, vector<16x64xf32>
    %42 = tpu.concatenate %29, %0, %41 in 1 : vector<16x64xf32>, vector<16x64xf32>, vector<16x64xf32> -> vector<16x192xf32>
    %43 = arith.truncf %42 : vector<16x192xf32> to vector<16x192xbf16>
    %c0_13 = arith.constant 0 : index
    %c0_14 = arith.constant 0 : index
    %44 = vector.load %arg2[%c0_13, %c0_14] : memref<960x128xbf16, #tpu.memory_space<vmem>>, vector<192x128xbf16>
    %cst_15 = arith.constant dense<0.000000e+00> : vector<16x128xf32>
    %45 = tpu.matmul %43, %44, %cst_15 {dimension_numbers = #tpu.dot_dimension_numbers<[1], [0], [0], [1], [0, 0, 1, 1], [], []>} : vector<16x192xbf16>, vector<192x128xbf16>, vector<16x128xf32> -> vector<16x128xf32>
    %c0_16 = arith.constant 0 : index
    %c0_17 = arith.constant 0 : index
    %46 = vector.load %arg3[%c0_16, %c0_17] : memref<72x128xf32, #tpu.memory_space<vmem>>, vector<1x128xf32>
    %47 = vector.broadcast %46 : vector<1x128xf32> to vector<16x128xf32>
    %48 = arith.mulf %45, %47 : vector<16x128xf32>
    %c8 = arith.constant 8 : index
    %c0_18 = arith.constant 0 : index
    %49 = vector.load %arg3[%c8, %c0_18] : memref<72x128xf32, #tpu.memory_space<vmem>>, vector<1x128xf32>
    %50 = vector.broadcast %49 : vector<1x128xf32> to vector<16x128xf32>
    %51 = arith.addf %48, %50 : vector<16x128xf32>
    %cst_19 = arith.constant 0.000000e+00 : f32
    %52 = vector.broadcast %cst_19 : f32 to vector<16x128xf32>
    %53 = arith.subf %52, %51 : vector<16x128xf32>
    %54 = math.exp %53 : vector<16x128xf32>
    %cst_20 = arith.constant 1.000000e+00 : f32
    %55 = vector.broadcast %cst_20 : f32 to vector<16x128xf32>
    %56 = arith.addf %55, %54 : vector<16x128xf32>
    %57 = tpu.reciprocal %56 {approx = true} : vector<16x128xf32> -> vector<16x128xf32>
    %58 = arith.mulf %51, %57 : vector<16x128xf32>
    %59 = tpu.iota {dimensions = array<i32: 0>} : vector<16x128xi32>
    %c16_i32_21 = arith.constant 16 : i32
    %c0_i32_22 = arith.constant 0 : i32
    %60 = arith.cmpi eq, %c16_i32_21, %c0_i32_22 : i32
    %c1_i32_23 = arith.constant 1 : i32
    %61 = arith.select %60, %c1_i32_23, %c16_i32_21 : i32
    %62 = vector.broadcast %61 : i32 to vector<16x128xi32>
    %63 = arith.remsi %59, %62 : vector<16x128xi32>
    %c0_i32_24 = arith.constant 0 : i32
    %64 = vector.broadcast %c0_i32_24 : i32 to vector<16x128xi32>
    %65 = arith.cmpi ne, %63, %64 : vector<16x128xi32>
    %c0_i32_25 = arith.constant 0 : i32
    %66 = vector.broadcast %c0_i32_25 : i32 to vector<16x128xi32>
    %67 = arith.cmpi slt, %63, %66 : vector<16x128xi32>
    %c0_i32_26 = arith.constant 0 : i32
    %68 = arith.cmpi slt, %61, %c0_i32_26 : i32
    %69 = vector.broadcast %68 : i1 to vector<16x128xi1>
    %70 = vector.broadcast %69 : vector<16x128xi1> to vector<16x128xi1>
    %71 = arith.xori %67, %70 : vector<16x128xi1>
    %72 = arith.andi %71, %65 : vector<16x128xi1>
    %73 = vector.broadcast %61 : i32 to vector<16x128xi32>
    %74 = arith.addi %63, %73 : vector<16x128xi32>
    %75 = arith.select %72, %74, %63 : vector<16x128xi1>, vector<16x128xi32>
    %c1_i32_27 = arith.constant 1 : i32
    %76 = tpu.dynamic_rotate %58 by %c1_i32_27 dim 0 : vector<16x128xf32>, i32 -> vector<16x128xf32>
    %c-1_i32_28 = arith.constant -1 : i32
    %77 = vector.broadcast %c-1_i32_28 : i32 to vector<16x128xi32>
    %78 = arith.addi %75, %77 : vector<16x128xi32>
    %c0_i32_29 = arith.constant 0 : i32
    %79 = vector.broadcast %c0_i32_29 : i32 to vector<16x128xi32>
    %80 = arith.cmpi sge, %78, %79 : vector<16x128xi32>
    %c-1_i32_30 = arith.constant -1 : i32
    %81 = vector.broadcast %c-1_i32_30 : i32 to vector<16x128xi32>
    %82 = arith.addi %75, %81 : vector<16x128xi32>
    %c16_i32_31 = arith.constant 16 : i32
    %83 = vector.broadcast %c16_i32_31 : i32 to vector<16x128xi32>
    %84 = arith.cmpi slt, %82, %83 : vector<16x128xi32>
    %85 = arith.andi %80, %84 : vector<16x128xi1>
    %cst_32 = arith.constant 0.000000e+00 : f32
    %86 = vector.broadcast %cst_32 : f32 to vector<16x128xf32>
    %87 = arith.select %85, %76, %86 : vector<16x128xi1>, vector<16x128xf32>
    %c15_i32_33 = arith.constant 15 : i32
    %88 = tpu.dynamic_rotate %58 by %c15_i32_33 dim 0 : vector<16x128xf32>, i32 -> vector<16x128xf32>
    %c1_i32_34 = arith.constant 1 : i32
    %89 = vector.broadcast %c1_i32_34 : i32 to vector<16x128xi32>
    %90 = arith.addi %75, %89 : vector<16x128xi32>
    %c0_i32_35 = arith.constant 0 : i32
    %91 = vector.broadcast %c0_i32_35 : i32 to vector<16x128xi32>
    %92 = arith.cmpi sge, %90, %91 : vector<16x128xi32>
    %c1_i32_36 = arith.constant 1 : i32
    %93 = vector.broadcast %c1_i32_36 : i32 to vector<16x128xi32>
    %94 = arith.addi %75, %93 : vector<16x128xi32>
    %c16_i32_37 = arith.constant 16 : i32
    %95 = vector.broadcast %c16_i32_37 : i32 to vector<16x128xi32>
    %96 = arith.cmpi slt, %94, %95 : vector<16x128xi32>
    %97 = arith.andi %92, %96 : vector<16x128xi1>
    %cst_38 = arith.constant 0.000000e+00 : f32
    %98 = vector.broadcast %cst_38 : f32 to vector<16x128xf32>
    %99 = arith.select %97, %88, %98 : vector<16x128xi1>, vector<16x128xf32>
    %100 = tpu.concatenate %87, %58, %99 in 1 : vector<16x128xf32>, vector<16x128xf32>, vector<16x128xf32> -> vector<16x384xf32>
    %101 = arith.truncf %100 : vector<16x384xf32> to vector<16x384xbf16>
    %c192 = arith.constant 192 : index
    %c0_39 = arith.constant 0 : index
    %102 = vector.load %arg2[%c192, %c0_39] : memref<960x128xbf16, #tpu.memory_space<vmem>>, vector<384x128xbf16>
    %cst_40 = arith.constant dense<0.000000e+00> : vector<16x128xf32>
    %103 = tpu.matmul %101, %102, %cst_40 {dimension_numbers = #tpu.dot_dimension_numbers<[1], [0], [0], [1], [0, 0, 1, 1], [], []>} : vector<16x384xbf16>, vector<384x128xbf16>, vector<16x128xf32> -> vector<16x128xf32>
    %c16 = arith.constant 16 : index
    %c0_41 = arith.constant 0 : index
    %104 = vector.load %arg3[%c16, %c0_41] : memref<72x128xf32, #tpu.memory_space<vmem>>, vector<1x128xf32>
    %105 = vector.broadcast %104 : vector<1x128xf32> to vector<16x128xf32>
    %106 = arith.mulf %103, %105 : vector<16x128xf32>
    %c24 = arith.constant 24 : index
    %c0_42 = arith.constant 0 : index
    %107 = vector.load %arg3[%c24, %c0_42] : memref<72x128xf32, #tpu.memory_space<vmem>>, vector<1x128xf32>
    %108 = vector.broadcast %107 : vector<1x128xf32> to vector<16x128xf32>
    %109 = arith.addf %106, %108 : vector<16x128xf32>
    %cst_43 = arith.constant 0.000000e+00 : f32
    %110 = vector.broadcast %cst_43 : f32 to vector<16x128xf32>
    %111 = arith.maximumf %109, %110 : vector<16x128xf32>
    %112 = arith.truncf %111 : vector<16x128xf32> to vector<16x128xbf16>
    %c576 = arith.constant 576 : index
    %c0_44 = arith.constant 0 : index
    %113 = vector.load %arg2[%c576, %c0_44] : memref<960x128xbf16, #tpu.memory_space<vmem>>, vector<128x128xbf16>
    %cst_45 = arith.constant dense<0.000000e+00> : vector<16x128xf32>
    %114 = tpu.matmul %112, %113, %cst_45 {dimension_numbers = #tpu.dot_dimension_numbers<[1], [0], [0], [1], [0, 0, 1, 1], [], []>} : vector<16x128xbf16>, vector<128x128xbf16>, vector<16x128xf32> -> vector<16x128xf32>
    %c32 = arith.constant 32 : index
    %c0_46 = arith.constant 0 : index
    %115 = vector.load %arg3[%c32, %c0_46] : memref<72x128xf32, #tpu.memory_space<vmem>>, vector<1x128xf32>
    %116 = vector.broadcast %115 : vector<1x128xf32> to vector<16x128xf32>
    %117 = arith.mulf %114, %116 : vector<16x128xf32>
    %c40 = arith.constant 40 : index
    %c0_47 = arith.constant 0 : index
    %118 = vector.load %arg3[%c40, %c0_47] : memref<72x128xf32, #tpu.memory_space<vmem>>, vector<1x128xf32>
    %119 = vector.broadcast %118 : vector<1x128xf32> to vector<16x128xf32>
    %120 = arith.addf %117, %119 : vector<16x128xf32>
    %cst_48 = arith.constant 0.000000e+00 : f32
    %121 = vector.broadcast %cst_48 : f32 to vector<16x128xf32>
    %122 = arith.maximumf %120, %121 : vector<16x128xf32>
    %123 = arith.truncf %122 : vector<16x128xf32> to vector<16x128xbf16>
    %c704 = arith.constant 704 : index
    %c0_49 = arith.constant 0 : index
    %124 = vector.load %arg2[%c704, %c0_49] : memref<960x128xbf16, #tpu.memory_space<vmem>>, vector<128x128xbf16>
    %cst_50 = arith.constant dense<0.000000e+00> : vector<16x128xf32>
    %125 = tpu.matmul %123, %124, %cst_50 {dimension_numbers = #tpu.dot_dimension_numbers<[1], [0], [0], [1], [0, 0, 1, 1], [], []>} : vector<16x128xbf16>, vector<128x128xbf16>, vector<16x128xf32> -> vector<16x128xf32>
    %c48 = arith.constant 48 : index
    %c0_51 = arith.constant 0 : index
    %126 = vector.load %arg3[%c48, %c0_51] : memref<72x128xf32, #tpu.memory_space<vmem>>, vector<1x128xf32>
    %127 = vector.broadcast %126 : vector<1x128xf32> to vector<16x128xf32>
    %128 = arith.addf %125, %127 : vector<16x128xf32>
    %c56 = arith.constant 56 : index
    %c0_52 = arith.constant 0 : index
    %129 = vector.load %arg3[%c56, %c0_52] : memref<72x128xf32, #tpu.memory_space<vmem>>, vector<1x128xf32>
    %130 = vector.broadcast %129 : vector<1x128xf32> to vector<16x128xf32>
    %131 = arith.mulf %128, %130 : vector<16x128xf32>
    %c64 = arith.constant 64 : index
    %c0_53 = arith.constant 0 : index
    %132 = vector.load %arg3[%c64, %c0_53] : memref<72x128xf32, #tpu.memory_space<vmem>>, vector<1x128xf32>
    %133 = vector.broadcast %132 : vector<1x128xf32> to vector<16x128xf32>
    %134 = arith.addf %131, %133 : vector<16x128xf32>
    %cst_54 = arith.constant 0.000000e+00 : f32
    %135 = vector.broadcast %cst_54 : f32 to vector<16x128xf32>
    %136 = arith.cmpf oge, %134, %135 : vector<16x128xf32>
    %cst_55 = arith.constant 1.000000e-01 : f32
    %137 = vector.broadcast %cst_55 : f32 to vector<16x128xf32>
    %138 = arith.mulf %137, %134 : vector<16x128xf32>
    %139 = arith.select %136, %134, %138 : vector<16x128xi1>, vector<16x128xf32>
    %140 = arith.addf %58, %139 : vector<16x128xf32>
    %141 = tpu.iota {dimensions = array<i32: 0>} : vector<16x128xi32>
    %c16_i32_56 = arith.constant 16 : i32
    %c0_i32_57 = arith.constant 0 : i32
    %142 = arith.cmpi eq, %c16_i32_56, %c0_i32_57 : i32
    %c1_i32_58 = arith.constant 1 : i32
    %143 = arith.select %142, %c1_i32_58, %c16_i32_56 : i32
    %144 = vector.broadcast %143 : i32 to vector<16x128xi32>
    %145 = arith.remsi %141, %144 : vector<16x128xi32>
    %c0_i32_59 = arith.constant 0 : i32
    %146 = vector.broadcast %c0_i32_59 : i32 to vector<16x128xi32>
    %147 = arith.cmpi ne, %145, %146 : vector<16x128xi32>
    %c0_i32_60 = arith.constant 0 : i32
    %148 = vector.broadcast %c0_i32_60 : i32 to vector<16x128xi32>
    %149 = arith.cmpi slt, %145, %148 : vector<16x128xi32>
    %c0_i32_61 = arith.constant 0 : i32
    %150 = arith.cmpi slt, %143, %c0_i32_61 : i32
    %151 = vector.broadcast %150 : i1 to vector<16x128xi1>
    %152 = vector.broadcast %151 : vector<16x128xi1> to vector<16x128xi1>
    %153 = arith.xori %149, %152 : vector<16x128xi1>
    %154 = arith.andi %153, %147 : vector<16x128xi1>
    %155 = vector.broadcast %143 : i32 to vector<16x128xi32>
    %156 = arith.addi %145, %155 : vector<16x128xi32>
    %157 = arith.select %154, %156, %145 : vector<16x128xi1>, vector<16x128xi32>
    %c15_i32_62 = arith.constant 15 : i32
    %158 = tpu.dynamic_rotate %140 by %c15_i32_62 dim 0 : vector<16x128xf32>, i32 -> vector<16x128xf32>
    %c1_i32_63 = arith.constant 1 : i32
    %159 = vector.broadcast %c1_i32_63 : i32 to vector<16x128xi32>
    %160 = arith.addi %157, %159 : vector<16x128xi32>
    %c16_i32_64 = arith.constant 16 : i32
    %161 = vector.broadcast %c16_i32_64 : i32 to vector<16x128xi32>
    %162 = arith.cmpi slt, %160, %161 : vector<16x128xi32>
    %cst_65 = arith.constant 0.000000e+00 : f32
    %163 = vector.broadcast %cst_65 : f32 to vector<16x128xf32>
    %164 = arith.select %162, %158, %163 : vector<16x128xi1>, vector<16x128xf32>
    %165 = arith.maximumf %140, %164 : vector<16x128xf32>
    %c120_i32 = arith.constant 120 : i32
    %166 = tpu.dynamic_rotate %165 by %c120_i32 dim 1 : vector<16x128xf32>, i32 -> vector<16x128xf32>
    %167 = arith.maximumf %165, %166 : vector<16x128xf32>
    %168 = arith.truncf %167 : vector<16x128xf32> to vector<16x128xbf16>
    %c832 = arith.constant 832 : index
    %c0_66 = arith.constant 0 : index
    %169 = vector.load %arg2[%c832, %c0_66] : memref<960x128xbf16, #tpu.memory_space<vmem>>, vector<128x128xbf16>
    %cst_67 = arith.constant dense<0.000000e+00> : vector<16x128xf32>
    %170 = tpu.matmul %168, %169, %cst_67 {dimension_numbers = #tpu.dot_dimension_numbers<[1], [0], [0], [1], [0, 0, 1, 1], [], []>} : vector<16x128xbf16>, vector<128x128xbf16>, vector<16x128xf32> -> vector<16x128xf32>
    %c0_68 = arith.constant 0 : index
    %c0_69 = arith.constant 0 : index
    %171 = vector.load %arg4[%c0_68, %c0_69] : memref<16x128xf32, #tpu.memory_space<vmem>>, vector<16x128xf32>
    tpu.vector_store %arg4[%c0_68, %c0_69], %170 {strides = array<i32>} : memref<16x128xf32, #tpu.memory_space<vmem>>, vector<16x128xf32>,
    return
  }
  func.func @transform_0(%arg0: i32) -> (i32, i32) {
    %c0_i32 = arith.constant 0 : i32
    %c0_i32_0 = arith.constant 0 : i32
    return %arg0, %c0_i32 : i32, i32
  }
  func.func @transform_1(%arg0: i32) -> (i32, i32) {
    %c0_i32 = arith.constant 0 : i32
    %c0_i32_0 = arith.constant 0 : i32
    %c0_i32_1 = arith.constant 0 : i32
    return %c0_i32, %c0_i32_0 : i32, i32
  }
  func.func @transform_2(%arg0: i32) -> (i32, i32) {
    %c0_i32 = arith.constant 0 : i32
    %c0_i32_0 = arith.constant 0 : i32
    %c0_i32_1 = arith.constant 0 : i32
    return %c0_i32, %c0_i32_0 : i32, i32
  }
  func.func @transform_3(%arg0: i32) -> (i32, i32) {
    %c0_i32 = arith.constant 0 : i32
    %c0_i32_0 = arith.constant 0 : i32
    return %arg0, %c0_i32 : i32, i32
  }
}

</mosaic_0001>

<bundles_post_ra>
// kernel: forward.1
= control target key start
LH: loop header
LB: loop body
LE: loop exit
PB: predicated region body
PF: predicated region fallthrough
CT: control target
= control target key end

     0   :  { %8 = vsyncpa [#allocation3], 0  ;;  %s1458_s12 = smov 0   ;;  %s1722_s0 = inlined_call_operand.vmem [shape: f32[32,64], index: 0, kind: input, shape index: {}]   ;;  %s1723_s1 = inlined_call_operand.vmem [shape: bf16[960,128], index: 1, kind: input, shape index: {}]   ;;  %s1724_s2 = inlined_call_operand.hbm [shape: f32[72,128], index: 2, kind: input, shape index: {}]   ;;  %s1725_s3 = inlined_call_operand.vmem [shape: f32[32,128], index: 3, kind: output, shape index: {}]  }
   0x1 LB: > { %s127_s15 = sshll.u32 %s1724_s2, 4  ;;  %s1019_s16 = sadd.s32 4294967295, %s1430_s12   ;;  %s1430_s12 = sphi %s1458_s12, %s14_s12   ;;  %s128_s15 = int_to_ptr.hbm [resolvable:$true] %s127_s15 }
   0x2   : > { %p1021_p0 = scmp.ge.s32.totalorder %s1430_s12, 1  ;;  %p113_p1 = scmp.lt.s32.totalorder %s1430_s12, 3 }
   0x3   : > { %p1347_p2 = scmp.eq.s32.totalorder %s1019_s16, 0  ;;  %s1432_s17 = smov [#allocation2]  }
   0x4   : > { %p114_p3 = pnand %p1021_p0, %p113_p1  ;;  %s129_s18 = sshll.u32 %s1432_s17, 4  ;;  %s130_s18 = int_to_ptr.vmem [resolvable:$true] %s129_s18 }
   0x5   : > { %s1433_s19 = smov 128   ;;  %s1434_s20 = smov 8  }
   0x6   : > { %p1343_p4 = pneg %p114_p3  ;;  %154 = sbr.rel (%p114_p3) target bundleno = 1023 (0x3ff), region = 32 }
   0x8   : > { %p1344_p5 = pnand %p1347_p2, %p1343_p4 }
   0xa   : > { %1346 = dma.hbm_to_vmem [thread:$0]  (!%p1344_p5), %s128_s15, 1152, %s130_s18, [#allocation3], %s1433_s19, %s1433_s19, %s1434_s20  }
   0xb   : > { %1425 = dma.done.wait (%p1347_p2), [#allocation3], 1152  }
   0xc   : > { %1427 = vsyncadd (%p1347_p2), [#allocation3], 4294966144  ;;  %s1026_s21 = sshll.u32 %s1019_s16, 1  ;;  %v194_v0 = vlaneseq  ;;  %v1286_v5 = vld [vmem:[%s1723_s1 + $0x38] sm:$0xff]  ;;  %v1285_v9 = vld [vmem:[%s1723_s1 + $0x30] sm:$0xff]  ;;  %s1435_s5 = smov 64  }
   0xd   : > { %p180_p6 = scmp.lt.s32.totalorder %s1026_s21, 3  ;;  %v1290_v8 = vld [vmem:[%s1723_s1 + $0x58] sm:$0xff]  ;;  %363 = vmatpush.bf16.msra.mxu0 %v1286_v5  ;;  %v1289_v11 = vld [vmem:[%s1723_s1 + $0x50] sm:$0xff]  ;;  %v1284_v14 = vld [vmem:[%s1723_s1 + $0x28] sm:$0xff]  ;;  %vm259_vm2 = vcmask 523264   ;;  %vm1436_vm5 = vmmov 1  }
   0xe   : > { %v1469_v1 = vshrl.u32 %v194_v0, 7  ;;  %381 = vmatpush.bf16.msra.mxu1 %v1290_v8  ;;  %v1288_v15 = vld [vmem:[%s1723_s1 + $0x48] sm:$0xff]  ;;  %v1283_v17 = vld [vmem:[%s1723_s1 + $0x20] sm:$0xff]  ;;  %v1282_v21 = vld [vmem:[%s1723_s1 + $0x18] sm:$0xff] }
   0xf   : > { %s1727_s21 = smov (!%p180_p6, %s1026_s21), 3  ;;  %v1287_v18 = vld [vmem:[%s1723_s1 + $0x40] sm:$0xff]  ;;  %v1281_v23 = vld [vmem:[%s1723_s1 + $0x10] sm:$0xff]  ;;  %v1280_v24 = vld [vmem:[%s1723_s1 + $0x8] sm:$0xff] }
  0x10   : > { %v196_v2 = vadd.s32 8, %v1469_v1  ;;  %s1027_s22 = sshll.u32 %s1727_s21, 3  ;;  %vm238_vm0 = vcmp.lt.s32.totalorder %v1469_v1, 7  ;;  %vm223_vm3 = vcmp.lt.s32.totalorder %v1469_v1, 1  ;;  %v1279_v27 = vld [vmem:[%s1723_s1] sm:$0xff]  ;;  %v201_v30 = vand.u32 15, %v1469_v1 }
  0x11   : > { %s183_s25 = scalar_lea.vmem %s1722_s0, %s1027_s22  ;;  %364 = vmatpush.bf16.msra.mxu0 %v1285_v9  ;;  %v1306_v39 = vld [vmem:[%s1723_s1 + $0xd8] sm:$0xff]  ;;  %v1305_v42 = vld [vmem:[%s1723_s1 + $0xd0] sm:$0xff]  ;;  %v1304_v45 = vld [vmem:[%s1723_s1 + $0xc8] sm:$0xff]  ;;  %s189_s30 = scalar_lea.vmem %s1725_s3, %s1027_s22 }
  0x12   : > { %v192_v3 = vld [vmem:[%s183_s25] sm:$0xff]  ;;  %v193_v4 = vld [vmem:[%s183_s25 + $0x8] sm:$0xff]  ;;  %v208_v6 = vand.u32 15, %v196_v2  ;;  %382 = vmatpush.bf16.msra.mxu1 %v1289_v11  ;;  %v1533_v31 = vadd.s32 4294967295, %v201_v30  ;;  %632 = vmatpush.bf16.msra.mxu3 %v1306_v39  ;;  %v1298_v40 = vld [vmem:[%s1723_s1 + $0x98] sm:$0xff]  ;;  %s1437_s25 = smov 120  }
  0x13   : > { %v1363_v7 = vpack.i.bf16 %v193_v4, %v192_v3  ;;  %v237_v10 = vrot.slane %v193_v4, 1  ;;  %v236_v12 = vrot.slane %v192_v3, 1  ;;  %v222_v25 = vrot.slane %v193_v4, 7  ;;  %v1314_v41 = vld [vmem:[%s1723_s1 + $0x118] sm:$0xff]  ;;  %618 = vmatpush.bf16.msra.mxu2 %v1298_v40  ;;  %v1297_v43 = vld [vmem:[%s1723_s1 + $0x90] sm:$0xff]  ;;  %v1296_v46 = vld [vmem:[%s1723_s1 + $0x88] sm:$0xff] }
  0x14   : > { %v1492_v13 = vadd.s32 1, %v208_v6  ;;  %v221_v26 = vrot.slane %v192_v3, 7  ;;  %vm228_vm4 = vcmp.ge.s32.totalorder %v1533_v31, 0  ;;  %v1313_v44 = vld [vmem:[%s1723_s1 + $0x110] sm:$0xff]  ;;  %v1312_v47 = vld [vmem:[%s1723_s1 + $0x108] sm:$0xff]  ;;  %v1303_v48 = vld [vmem:[%s1723_s1 + $0xc0] sm:$0xff] }
  0x15   : > { %1364 = vrot.lane.b32.xlu0 %v1363_v7, %s1435_s5  ;;  %v240_v16 = vsel %vm238_vm0, %v237_v10, %v236_v12  ;;  %365 = vmatpush.bf16.msra.mxu0 %v1284_v14  ;;  %v239_v19 = vsel %vm238_vm0, %v236_v12, %v237_v10  ;;  %v1295_v49 = vld [vmem:[%s1723_s1 + $0x80] sm:$0xff]  ;;  %v1302_v51 = vld [vmem:[%s1723_s1 + $0xb8] sm:$0xff]  ;;  %v1301_v54 = vld [vmem:[%s1723_s1 + $0xb0] sm:$0xff] }
  0x16   : > { %vm246_vm1 = vcmp.lt.s32.totalorder %v1492_v13, 16  ;;  %383 = vmatpush.bf16.msra.mxu1 %v1288_v15  ;;  %v224_v28 = vsel %vm223_vm3, %v221_v26, %v222_v25  ;;  %v225_v29 = vsel %vm223_vm3, %v222_v25, %v221_v26  ;;  %633 = vmatpush.bf16.msra.mxu3 %v1305_v42  ;;  %v1311_v50 = vld [vmem:[%s1723_s1 + $0x100] sm:$0xff]  ;;  %v1294_v52 = vld [vmem:[%s1723_s1 + $0x78] sm:$0xff]  ;;  %v1293_v55 = vld [vmem:[%s1723_s1 + $0x70] sm:$0xff] }
  0x17   : > { %v250_v20 = vsel %vm246_vm1, %v240_v16, 0.0  ;;  %v234_v33 = vsel %vm228_vm4, %v225_v29, 0.0  ;;  %619 = vmatpush.bf16.msra.mxu2 %v1297_v43  ;;  %v1310_v53 = vld [vmem:[%s1723_s1 + $0xf8] sm:$0xff]  ;;  %v1309_v56 = vld [vmem:[%s1723_s1 + $0xf0] sm:$0xff]  ;;  %v1300_v58 = vld [vmem:[%s1723_s1 + $0xa8] sm:$0xff] }
  0x18   : > { %v263_v22 = vpack.c.bf16 %v250_v20, %v239_v19  ;;  %v1373_v59 = vld [vmem:[#allocation2] ss:$0 sm:$0xff]  ;;  %v1374_v62 = vld [vmem:[#allocation2 + $0x8] ss:$0 sm:$0xff]  ;;  %v1322_v12 = vld [vmem:[%s1723_s1 + $0x158] sm:$0xff] }
  0x19   : > { %366 = vmatpush.bf16.msra.mxu0 %v1283_v17  ;;  %v1292_v63 = vld [vmem:[%s1723_s1 + $0x68] sm:$0xff]  ;;  %v1299_v2 = vld [vmem:[%s1723_s1 + $0xa0] sm:$0xff]  ;;  %vm1175_vm6 = vmpackc.low %vm1436_vm5, %vm228_vm4 }
  0x1a   : > { %384 = vmatpush.bf16.msra.mxu1 %v1287_v18  ;;  %634 = vmatpush.bf16.msra.mxu3 %v1304_v45  ;;  %v1308_v0 = vld [vmem:[%s1723_s1 + $0xe8] sm:$0xff]  ;;  %v1291_v4 = vld [vmem:[%s1723_s1 + $0x60] sm:$0xff]  ;;  %vm1178_vm7 = vmpackc.low %vm246_vm1, %vm1436_vm5 }
  0x1b   : > { %620 = vmatpush.bf16.msra.mxu2 %v1296_v46  ;;  %v1307_v6 = vld [vmem:[%s1723_s1 + $0xe0] sm:$0xff]  ;;  %v1321_v31 = vld [vmem:[%s1723_s1 + $0x150] sm:$0xff]  ;;  %v1318_v40 = vld [vmem:[%s1723_s1 + $0x138] sm:$0xff] }
  0x1c   : > { %v1319_v39 = vld [vmem:[%s1723_s1 + $0x140] sm:$0xff]  ;;  %v1316_v42 = vld [vmem:[%s1723_s1 + $0x128] sm:$0xff]  ;;  %v1329_v45 = vld [vmem:[%s1723_s1 + $0x190] sm:$0xff] }
  0x1d   : > { %367 = vmatpush.bf16.msra.mxu0 %v1282_v21  ;;  %1078 = vmatmul.msk.bf16.vlgmr.msra.gmra.mxu1 %vm259_vm2, %v263_v22  ;;  %v1315_v43 = vld [vmem:[%s1723_s1 + $0x120] sm:$0xff]  ;;  %v1328_v46 = vld [vmem:[%s1723_s1 + $0x188] sm:$0xff] }
  0x1e   : > { %646 = vmatpush.bf16.msrb.mxu1 %v1314_v41  ;;  %635 = vmatpush.bf16.msra.mxu3 %v1303_v48  ;;  %v1317_v41 = vld [vmem:[%s1723_s1 + $0x130] sm:$0xff]  ;;  %v1327_v48 = vld [vmem:[%s1723_s1 + $0x180] sm:$0xff] }
  0x1f   : > { %621 = vmatpush.bf16.msra.mxu2 %v1295_v49 }
  0x21   : > { %368 = vmatpush.bf16.msra.mxu0 %v1281_v23 }
  0x22   : > { %647 = vmatpush.bf16.msrb.mxu1 %v1313_v44  ;;  %636 = vmatpush.bf16.msra.mxu3 %v1302_v51  ;;  %v1330_v44 = vld [vmem:[%s1723_s1 + $0x198] sm:$0xff] }
  0x23   : > { %622 = vmatpush.bf16.msra.mxu2 %v1294_v52 }
  0x25   : > { %369 = vmatpush.bf16.msra.mxu0 %v1280_v24 }
  0x26   : > { %648 = vmatpush.bf16.msrb.mxu1 %v1312_v47  ;;  %637 = vmatpush.bf16.msra.mxu3 %v1301_v54 }
  0x27   : > { %623 = vmatpush.bf16.msra.mxu2 %v1293_v55 }
  0x29   : > { %370 = vmatpush.bf16.msra.mxu0 %v1279_v27 }
  0x2a   : > { %649 = vmatpush.bf16.msrb.mxu1 %v1311_v50  ;;  %638 = vmatpush.bf16.msra.mxu3 %v1300_v58  ;;  %v1376_v58 = vld [vmem:[#allocation2 + $0x18] ss:$0 sm:$0xff] }
  0x2b   : > { %624 = vmatpush.bf16.msra.mxu2 %v1292_v63 }
  0x2d   : > { %735 = vmatpush.bf16.msrb.mxu0 %v1322_v12 }
  0x2e   : > { %650 = vmatpush.bf16.msrb.mxu1 %v1310_v53  ;;  %639 = vmatpush.bf16.msra.mxu3 %v1299_v2  ;;  %v1375_v53 = vld [vmem:[#allocation2 + $0x10] ss:$0 sm:$0xff] }
  0x2f   : > { %625 = vmatpush.bf16.msra.mxu2 %v1291_v4  ;;  %v1326_v4 = vld [vmem:[%s1723_s1 + $0x178] sm:$0xff] }
  0x31   : > { %736 = vmatpush.bf16.msrb.mxu0 %v1321_v31 }
  0x32   : > { %651 = vmatpush.bf16.msrb.mxu1 %v1309_v56 }
  0x33   : > { %826 = vmatpush.bf16.msrb.mxu2 %v1330_v44 }
  0x36   : > { %652 = vmatpush.bf16.msrb.mxu1 %v1308_v0 }
  0x37   : > { %827 = vmatpush.bf16.msrb.mxu2 %v1329_v45  ;;  %v1332_v45 = vld [vmem:[%s1723_s1 + $0x1a8] sm:$0xff] }
  0x3a   : > { %653 = vmatpush.bf16.msrb.mxu1 %v1307_v6  ;;  %v1324_v6 = vld [vmem:[%s1723_s1 + $0x168] sm:$0xff] }
  0x3b   : > { %828 = vmatpush.bf16.msrb.mxu2 %v1328_v46 }
  0x3f   : > { %829 = vmatpush.bf16.msrb.mxu2 %v1327_v48 }
  0x43   : > { %830 = vmatpush.bf16.msrb.mxu2 %v1326_v4 }
  0x87   : > { %v1365_v32 = vpop.permute.xlu0 %1364 }
  0x88   : > { %v1367_v34 = vunpack.i.h.bf16 %v1365_v32  ;;  %v1366_v35 = vunpack.i.l.bf16 %v1365_v32 }
  0x8a   : > { %v260_v36 = vsel %vm259_vm2, %v234_v33, %v1366_v35  ;;  %v261_v37 = vsel %vm259_vm2, %v224_v28, %v1367_v34 }
  0x8b   : > { %v262_v38 = vpack.c.bf16 %v261_v37, %v260_v36 }
  0x8d   : > { %371 = vmatmul.bf16.vlgmr.msra.gmra.mxu0 %v262_v38  ;;  %v1320_v38 = vld [vmem:[%s1723_s1 + $0x148] sm:$0xff] }
  0x8e   : > { %737 = vmatpush.bf16.msrb.mxu0 %v1320_v38 }
  0x92   : > { %738 = vmatpush.bf16.msrb.mxu0 %v1319_v39 }
  0x96   : > { %739 = vmatpush.bf16.msrb.mxu0 %v1318_v40  ;;  %v1333_v40 = vld [vmem:[%s1723_s1 + $0x1b0] sm:$0xff] }
  0x9a   : > { %v386_v57 = vpop.f32.mrf.mxu1  ;;  %740 = vmatpush.bf16.msrb.mxu0 %v1317_v41 }
  0x9e   : > { %741 = vmatpush.bf16.msrb.mxu0 %v1316_v42 }
  0xa2   : > { %v388_v8 = vpop.f32.mrf.mxu1  ;;  %742 = vmatpush.bf16.msrb.mxu0 %v1315_v43 }
 0x10a   : > { %v372_v60 = vpop.f32.mrf.mxu0 }
 0x10b   : > { %v387_v61 = vadd.f32 %v386_v57, %v372_v60 }
 0x10d   : > { %v393_v3 = vmul.f32 %v1373_v59, %v387_v61 }
 0x10f   : > { %v397_v5 = vadd.f32 %v1374_v62, %v393_v3 }
 0x111   : > { %v399_v7 = vsub.f32 0.0, %v397_v5 }
 0x112   : > { %v374_v9 = vpop.f32.mrf.mxu0 }
 0x113   : > { %v401_v10 = vmul.f32 1.442695, %v399_v7  ;;  %v389_v11 = vadd.f32 %v388_v8, %v374_v9  ;;  %v1323_v7 = vld [vmem:[%s1723_s1 + $0x160] sm:$0xff] }
 0x114   : > { %v1377_v9 = vld [vmem:[#allocation2 + $0x20] ss:$0 sm:$0xff] }
 0x115   : > { %1382 = vpow2.f32 %v401_v10  ;;  %v394_v14 = vmul.f32 %v1373_v59, %v389_v11  ;;  %v1378_v11 = vld [vmem:[#allocation2 + $0x28] ss:$0 sm:$0xff] }
 0x117   : > { %v398_v15 = vadd.f32 %v1374_v62, %v394_v14 }
 0x119   : > { %v400_v16 = vsub.f32 0.0, %v398_v15 }
 0x11b   : > { %v1383_v17 = vpop.eup %1382  ;;  %v403_v18 = vmul.f32 1.442695, %v400_v16 }
 0x11c   : > { %v405_v19 = vadd.f32 1.0, %v1383_v17 }
 0x11d   : > { %1384 = vpow2.f32 %v403_v18 }
 0x11e   : > { %1386 = vrcp.f32 %v405_v19 }
 0x123   : > { %v1385_v20 = vpop.eup %1384 }
 0x124   : > { %v406_v21 = vadd.f32 1.0, %v1385_v20  ;;  %v1387_v22 = vpop.eup %1386  ;;  %v1338_v20 = vld [vmem:[%s1723_s1 + $0x1d8] sm:$0xff] }
 0x125   : > { %v1615_v23 = vmul.f32 %v1387_v22, %v397_v5  ;;  %v1325_v5 = vld [vmem:[%s1723_s1 + $0x170] sm:$0xff]  ;;  %935 = vmatpush.bf16.msrb.mxu3 %v1338_v20 }
 0x126   : > { %1388 = vrcp.f32 %v406_v21  ;;  %831 = vmatpush.bf16.msrb.mxu2 %v1325_v5  ;;  %v1379_v21 = vld [vmem:[#allocation2 + $0x30] ss:$0 sm:$0xff] }
 0x127   : > { %v411_v26 = vrot.slane %v1615_v23, 7  ;;  %v417_v29 = vrot.slane %v1615_v23, 1  ;;  %v1337_v22 = vld [vmem:[%s1723_s1 + $0x1d0] sm:$0xff] }
 0x129   : > { %936 = vmatpush.bf16.msrb.mxu3 %v1337_v22 }
 0x12a   : > { %832 = vmatpush.bf16.msrb.mxu2 %v1324_v6 }
 0x12c   : > { %v1389_v24 = vpop.eup %1388 }
 0x12d   : > { %v1617_v25 = vmul.f32 %v1389_v24, %v398_v15  ;;  %v1380_v24 = vld [vmem:[#allocation2 + $0x38] ss:$0 sm:$0xff] }
 0x12e   : > { %833 = vmatpush.bf16.msrb.mxu2 %v1323_v7 }
 0x12f   : > { %v424_v27 = vpack.c.bf16 %v1617_v25, %v1615_v23  ;;  %v412_v28 = vrot.slane %v1617_v25, 7  ;;  %v418_v30 = vrot.slane %v1617_v25, 1 }
 0x131   : > { %640 = vmatmul.bf16.vlgmr.msra.gmra.mxu3 %v424_v27  ;;  %v413_v32 = vsel %vm223_vm3, %v411_v26, %v412_v28  ;;  %v414_v33 = vsel %vm223_vm3, %v412_v28, %v411_v26  ;;  %v419_v34 = vsel %vm238_vm0, %v417_v29, %v418_v30  ;;  %v420_v35 = vsel %vm238_vm0, %v418_v30, %v417_v29  ;;  %v1381_v28 = vld [vmem:[#allocation2 + $0x40] ss:$0 sm:$0xff]  ;;  %v1336_v29 = vld [vmem:[%s1723_s1 + $0x1c8] sm:$0xff] }
 0x132   : > { %v1176_v36 = vpack.c.bf16 %v413_v32, %v414_v33  ;;  %v1179_v37 = vpack.c.bf16 %v420_v35, %v419_v34  ;;  %937 = vmatpush.bf16.msrb.mxu3 %v1336_v29  ;;  %v1335_v33 = vld [vmem:[%s1723_s1 + $0x1c0] sm:$0xff] }
 0x134   : > { %1177 = vmatmul.msk.bf16.vlgmr.msra.gmra.mxu2 %vm1175_vm6, %v1176_v36  ;;  %1180 = vmatmul.msk.bf16.vlgmr.msrb.gmra.mxu1 %vm1178_vm7, %v1179_v37  ;;  %v1334_v37 = vld [vmem:[%s1723_s1 + $0x1b8] sm:$0xff] }
 0x136   : > { %938 = vmatpush.bf16.msrb.mxu3 %v1335_v33 }
 0x13a   : > { %939 = vmatpush.bf16.msrb.mxu3 %v1334_v37 }
 0x13e   : > { %940 = vmatpush.bf16.msrb.mxu3 %v1333_v40 }
 0x142   : > { %941 = vmatpush.bf16.msrb.mxu3 %v1332_v45 }
 0x1b1   : > { %v655_v49 = vpop.f32.mrf.mxu1 }
 0x1b4   : > { %v641_v47 = vpop.f32.mrf.mxu3 }
 0x1b7   : > { %v627_v50 = vpop.f32.mrf.mxu2 }
 0x1b8   : > { %v642_v51 = vadd.f32 %v641_v47, %v627_v50 }
 0x1b9   : > { %v657_v59 = vpop.f32.mrf.mxu1 }
 0x1ba   : > { %v656_v52 = vadd.f32 %v655_v49, %v642_v51 }
 0x1bc   : > { %v643_v54 = vpop.f32.mrf.mxu3  ;;  %v662_v56 = vmul.f32 %v1375_v53, %v656_v52  ;;  %v1331_v52 = vld [vmem:[%s1723_s1 + $0x1a0] sm:$0xff] }
 0x1bd   : > { %942 = vmatpush.bf16.msrb.mxu3 %v1331_v52 }
 0x1be   : > { %v666_v62 = vadd.f32 %v1376_v58, %v662_v56 }
 0x1bf   : > { %v629_v55 = vpop.f32.mrf.mxu2 }
 0x1c0   : > { %v644_v57 = vadd.f32 %v643_v54, %v629_v55  ;;  %v668_v0 = vmax.f32 %v666_v62, 0.0 }
 0x1c2   : > { %v658_v60 = vadd.f32 %v657_v59, %v644_v57 }
 0x1c4   : > { %v663_v61 = vmul.f32 %v1375_v53, %v658_v60 }
 0x1c6   : > { %v667_v63 = vadd.f32 %v1376_v58, %v663_v61 }
 0x1c8   : > { %v669_v2 = vmax.f32 %v667_v63, 0.0 }
 0x1ca   : > { %v670_v3 = vpack.c.bf16 %v669_v2, %v668_v0 }
 0x1cc   : > { %743 = vmatmul.bf16.vlgmr.msrb.gmra.mxu0 %v670_v3 }
 0x249   : > { %v744_v8 = vpop.f32.mrf.mxu0 }
 0x24a   : > { %v751_v10 = vmul.f32 %v1377_v9, %v744_v8 }
 0x24c   : > { %v755_v14 = vadd.f32 %v1378_v11, %v751_v10 }
 0x24e   : > { %v757_v17 = vmax.f32 %v755_v14, 0.0 }
 0x251   : > { %v746_v12 = vpop.f32.mrf.mxu0 }
 0x252   : > { %v752_v15 = vmul.f32 %v1377_v9, %v746_v12 }
 0x254   : > { %v756_v16 = vadd.f32 %v1378_v11, %v752_v15 }
 0x256   : > { %v758_v18 = vmax.f32 %v756_v16, 0.0 }
 0x258   : > { %v759_v19 = vpack.c.bf16 %v758_v18, %v757_v17 }
 0x25a   : > { %834 = vmatmul.bf16.vlgmr.msrb.gmra.mxu2 %v759_v19 }
 0x2dd   : > { %v835_v26 = vpop.f32.mrf.mxu2 }
 0x2de   : > { %v836_v27 = vadd.f32 %v1379_v21, %v835_v26 }
 0x2e0   : > { %v842_v30 = vmul.f32 %v1380_v24, %v836_v27 }
 0x2e2   : > { %v846_v32 = vadd.f32 %v1381_v28, %v842_v30 }
 0x2e4   : > { %v850_v35 = vmul.f32 0.1, %v846_v32  ;;  %vm848_vm8 = vcmp.ge.f32.partialorder %v846_v32, 0.0 }
 0x2e5   : > { %v837_v34 = vpop.f32.mrf.mxu2 }
 0x2e6   : > { %v838_v36 = vadd.f32 %v1379_v21, %v837_v34  ;;  %v852_v39 = vsel %vm848_vm8, %v846_v32, %v850_v35 }
 0x2e7   : > { %v854_v42 = vadd.f32 %v852_v39, %v1615_v23 }
 0x2e8   : > { %v843_v31 = vmul.f32 %v1380_v24, %v838_v36 }
 0x2e9   : > { %v856_v46 = vrot.slane %v854_v42, 1 }
 0x2ea   : > { %v847_v38 = vadd.f32 %v1381_v28, %v843_v31 }
 0x2ec   : > { %vm849_vm9 = vcmp.ge.f32.partialorder %v847_v38, 0.0  ;;  %v851_v41 = vmul.f32 0.1, %v847_v38 }
 0x2ee   : > { %v853_v43 = vsel %vm849_vm9, %v847_v38, %v851_v41 }
 0x2ef   : > { %v855_v44 = vadd.f32 %v853_v43, %v1617_v25 }
 0x2f1   : > { %v857_v47 = vrot.slane %v855_v44, 1 }
 0x2f3   : > { %v858_v48 = vsel %vm238_vm0, %v856_v46, %v857_v47  ;;  %v859_v49 = vsel %vm238_vm0, %v857_v47, %v856_v46 }
 0x2f4   : > { %v861_v23 = vsel %vm246_vm1, %v859_v49, 0.0  ;;  %v862_v50 = vmax.f32 %v854_v42, %v858_v48 }
 0x2f5   : > { %v863_v25 = vmax.f32 %v855_v44, %v861_v23 }
 0x2f7   : > { %v1368_v51 = vpack.i.bf16 %v863_v25, %v862_v50 }
 0x2f9   : > { %1369 = vrot.lane.b32.xlu0 %v1368_v51, %s1437_s25 }
 0x36b   : > { %v1370_v53 = vpop.permute.xlu0 %1369 }
 0x36c   : > { %v1372_v54 = vunpack.i.h.bf16 %v1370_v53  ;;  %v1371_v55 = vunpack.i.l.bf16 %v1370_v53 }
 0x36e   : > { %v869_v1 = vmax.f32 %v863_v25, %v1372_v54  ;;  %v868_v56 = vmax.f32 %v862_v50, %v1371_v55 }
 0x370   : > { %v870_v57 = vpack.c.bf16 %v869_v1, %v868_v56 }
 0x372   : > { %943 = vmatmul.bf16.vlgmr.msrb.gmra.mxu3 %v870_v57 }
 0x3f5   : > { %v944_v13 = vpop.f32.mrf.mxu3 }
 0x3f6   : > { %949 = vst [vmem:[%s189_s30] sm:$0xff] %v944_v13 }
 0x3fd   : > { %v946_v58 = vpop.f32.mrf.mxu3 }
 0x3fe   : > { %950 = vst [vmem:[%s189_s30 + $0x8] sm:$0xff] %v946_v58 }
 0x3ff PF: > { %s14_s12 = sadd.s32 1, %s1430_s12  }
 0x400   : > { %p11_p7 = scmp.ge.s32.totalorder %s14_s12, 4  }
 0x402   :  { %13 = sbr.rel (!%p11_p7) target bundleno = 1 (0x1), region = 67 }
 0x407   :  { %973 = vsyncpa [#allocation3], 1 }
 0x408   :  { %975 = vsyncpa [#allocation3 + $0x1], 1 }

</bundles_post_ra>
